<compile_context>
chip_gen: v7x
topology: tpu7x:2x2x1
jax: 0.10.0
libtpu: 0.0.40
codegen_flags: <defaults>
</compile_context>

<pallas_src>
import functools

import jax
import jax.numpy as jnp
from jax.experimental import pallas as pl
from jax.experimental.pallas import tpu as pltpu

ACTION_NUM = 2
HIDDEN = 16


def _actor_kernel(sample_action, sel_ref, state_ref, w_ref, b_ref, out_ref):
    B = state_ref.shape[0]
    Dp = state_ref.shape[1]          # state dim padded to a multiple of 8
    A = ACTION_NUM
    H = HIDDEN

    x = state_ref[...]                                   # (B, Dp)

    # Packed parameter slabs (all slices are sublane-tile aligned).
    w1 = w_ref[0:Dp, :]                                  # (Dp, 16), pad rows zero
    w2 = w_ref[Dp:Dp + H, :]                             # (16, 16)
    w3 = w_ref[Dp + H:Dp + 2 * H, :]                     # (16, 16), cols >= A zero
    b1 = b_ref[0:1, :]                                   # (1, 16)
    b2 = b_ref[1:2, :]                                   # (1, 16)
    b3 = b_ref[2:3, :]                                   # (1, 16), cols >= A zero

    h1 = jnp.maximum(jnp.dot(x, w1, preferred_element_type=jnp.float32) + b1, 0.0)
    h2 = jnp.maximum(jnp.dot(h1, w2, preferred_element_type=jnp.float32) + b2, 0.0)
    logits = jnp.dot(h2, w3, preferred_element_type=jnp.float32) + b3    # (B, 16)

    # Masked, numerically stable softmax / log-softmax over the first A lanes.
    lane = jax.lax.broadcasted_iota(jnp.int32, (B, H), 1)
    valid = lane < A
    neg_big = jnp.float32(-1e30)
    m = jnp.max(jnp.where(valid, logits, neg_big), axis=1, keepdims=True)  # (B, 1)
    e = jnp.where(valid, jnp.exp(logits - m), 0.0)                         # (B, 16)
    z = jnp.sum(e, axis=1, keepdims=True)                                  # (B, 1)
    inv_z = 1.0 / z
    logp = logits - m - jnp.log(z)                                         # (B, 16)

    # entropy = -sum_a p_a * log p_a  (only valid lanes contribute)
    ent = -jnp.sum(jnp.where(valid, e * logp, 0.0), axis=1, keepdims=True) * inv_z

    if sample_action:
        # Categorical sample via inverse CDF (A == 2): act = 1 iff u >= P(0).
        u = sel_ref[...]                                                   # (B, 1)
        p0 = jnp.sum(jnp.where(lane == 0, e, 0.0), axis=1, keepdims=True) * inv_z
        act = (u >= p0).astype(jnp.int32)                                  # (B, 1)
    else:
        act = sel_ref[...]                                                 # (B, 1)

    # log_prob(act): pick the lane equal to act via a masked reduce.
    lp = jnp.sum(jnp.where(lane == act, logp, 0.0), axis=1, keepdims=True)  # (B, 1)

    # Pack all three results into one lane-dense slab (unmasked store):
    # lane 0 -> act, lane 1 -> log_prob, lanes 2.. -> entropy.
    lane_o = jax.lax.broadcasted_iota(jnp.int32, (B, 128), 1)
    out_ref[...] = jnp.where(lane_o == 0, act.astype(jnp.float32),
                             jnp.where(lane_o == 1, lp, ent))


def pack_actor_params(w1, b1, w2, b2, w3, b3):
    """One-time packing of the six Linear params into two arrays (amortized)."""
    state_dim = w1.shape[0]
    w1_rows = ((state_dim + 7) // 8) * 8
    w1p = jnp.pad(w1, ((0, w1_rows - state_dim), (0, 0)))
    w3p = jnp.pad(w3, ((0, 0), (0, HIDDEN - ACTION_NUM)))
    w_packed = jnp.concatenate([w1p, w2, w3p], axis=0)             # (w1_rows+32, 16)
    b3p = jnp.pad(b3.reshape(1, -1), ((0, 0), (0, HIDDEN - ACTION_NUM)))
    b_packed = jnp.concatenate(
        [b1.reshape(1, -1), b2.reshape(1, -1), b3p], axis=0)       # (3, 16)
    return w_packed, b_packed


def actor_forward(state, params, *, seed=None, action=None):
    """Returns (act, act_log_prob, act_entropy), matching the torch module."""
    w_packed, b_packed = params
    B, D = state.shape
    Dp = ((D + 7) // 8) * 8
    if Dp != D:
        state = jnp.pad(state, ((0, 0), (0, Dp - D)))
    sample = action is None

    vmem = pl.BlockSpec(memory_space=pltpu.MemorySpace.VMEM)

    if sample:
        if seed is None:
            raise ValueError("seed is required when action is None")
        key = jax.random.PRNGKey(seed)
        sel = jax.random.uniform(key, (B, 1), dtype=jnp.float32)
    else:
        # Out-of-range actions are not checked (torch's gather would error).
        sel = jnp.asarray(action, dtype=jnp.int32).reshape(B, 1)

    out = pl.pallas_call(
        functools.partial(_actor_kernel, sample),
        out_shape=jax.ShapeDtypeStruct((B, 128), jnp.float32),
        in_specs=[vmem, vmem, vmem, vmem],
        out_specs=vmem,
    )(sel, state, w_packed, b_packed)

    if sample:
        act = out[:, 0].astype(jnp.int32)
    else:
        act = jnp.asarray(action, dtype=jnp.int32).reshape(B)
    return act, out[:, 1], out[:, 2]


def init_actor_params(key, state_dim, action_num=ACTION_NUM):
    """Deterministic init mimicking torch.nn.Linear default, pre-packed."""
    assert action_num == ACTION_NUM == 2
    ks = jax.random.split(key, 6)

    def lin(kw, kb, fan_in, fan_out):
        bound = 1.0 / jnp.sqrt(fan_in)
        w = jax.random.uniform(kw, (fan_in, fan_out), jnp.float32, -bound, bound)
        b = jax.random.uniform(kb, (1, fan_out), jnp.float32, -bound, bound)
        return w, b

    w1, b1 = lin(ks[0], ks[1], state_dim, HIDDEN)
    w2, b2 = lin(ks[2], ks[3], HIDDEN, HIDDEN)
    w3, b3 = lin(ks[4], ks[5], HIDDEN, action_num)
    return pack_actor_params(w1, b1, w2, b2, w3, b3)


if __name__ == "__main__":
    key = jax.random.PRNGKey(0)
    k_param, k_state = jax.random.split(key, 2)

    B, STATE_DIM = 8, 4
    params = init_actor_params(k_param, STATE_DIM, ACTION_NUM)
    state = jax.random.normal(k_state, (B, STATE_DIM), dtype=jnp.float32)

    # action=None path (sample via host uniform + in-kernel inverse CDF)
    act, log_prob, entropy = actor_forward(state, params, seed=12345)
    jax.block_until_ready((act, log_prob, entropy))

    # provided-action path
    given = jnp.zeros((B,), dtype=jnp.int32)
    act2, log_prob2, entropy2 = actor_forward(state, params, action=given)
    jax.block_until_ready((act2, log_prob2, entropy2))

    print("KERNEL_OK")
</pallas_src>

<mosaic_0001>
module attributes {stable_mosaic.version = 11 : i64} {
  func.func @_actor_kernel(%arg0: memref<8x1xf32, #tpu.memory_space<vmem>>, %arg1: memref<8x8xf32, #tpu.memory_space<vmem>>, %arg2: memref<40x16xf32, #tpu.memory_space<vmem>>, %arg3: memref<3x16xf32, #tpu.memory_space<vmem>>, %arg4: memref<8x128xf32, #tpu.memory_space<vmem>>) attributes {dimension_semantics = [], scalar_prefetch = 0 : i64, scratch_operands = 0 : i64, tpu.core_type = #tpu.core_type<tc>} {
    %c0 = arith.constant 0 : index
    %c0_0 = arith.constant 0 : index
    %0 = vector.load %arg1[%c0, %c0_0] : memref<8x8xf32, #tpu.memory_space<vmem>>, vector<8x8xf32>
    %c0_1 = arith.constant 0 : index
    %c0_2 = arith.constant 0 : index
    %1 = vector.load %arg2[%c0_1, %c0_2] : memref<40x16xf32, #tpu.memory_space<vmem>>, vector<8x16xf32>
    %c8 = arith.constant 8 : index
    %c0_3 = arith.constant 0 : index
    %2 = vector.load %arg2[%c8, %c0_3] : memref<40x16xf32, #tpu.memory_space<vmem>>, vector<16x16xf32>
    %c24 = arith.constant 24 : index
    %c0_4 = arith.constant 0 : index
    %3 = vector.load %arg2[%c24, %c0_4] : memref<40x16xf32, #tpu.memory_space<vmem>>, vector<16x16xf32>
    %c0_5 = arith.constant 0 : index
    %c0_6 = arith.constant 0 : index
    %4 = vector.load %arg3[%c0_5, %c0_6] : memref<3x16xf32, #tpu.memory_space<vmem>>, vector<1x16xf32>
    %c1 = arith.constant 1 : index
    %c0_7 = arith.constant 0 : index
    %5 = vector.load %arg3[%c1, %c0_7] : memref<3x16xf32, #tpu.memory_space<vmem>>, vector<1x16xf32>
    %c2 = arith.constant 2 : index
    %c0_8 = arith.constant 0 : index
    %6 = vector.load %arg3[%c2, %c0_8] : memref<3x16xf32, #tpu.memory_space<vmem>>, vector<1x16xf32>
    %cst = arith.constant dense<0.000000e+00> : vector<8x16xf32>
    %7 = tpu.matmul %0, %1, %cst {dimension_numbers = #tpu.dot_dimension_numbers<[1], [0], [0], [1], [0, 0, 1, 1], [], []>} : vector<8x8xf32>, vector<8x16xf32>, vector<8x16xf32> -> vector<8x16xf32>
    %8 = vector.broadcast %4 : vector<1x16xf32> to vector<8x16xf32>
    %9 = arith.addf %7, %8 : vector<8x16xf32>
    %cst_9 = arith.constant 0.000000e+00 : f32
    %10 = vector.broadcast %cst_9 : f32 to vector<8x16xf32>
    %11 = arith.maximumf %9, %10 : vector<8x16xf32>
    %cst_10 = arith.constant dense<0.000000e+00> : vector<8x16xf32>
    %12 = tpu.matmul %11, %2, %cst_10 {dimension_numbers = #tpu.dot_dimension_numbers<[1], [0], [0], [1], [0, 0, 1, 1], [], []>} : vector<8x16xf32>, vector<16x16xf32>, vector<8x16xf32> -> vector<8x16xf32>
    %13 = vector.broadcast %5 : vector<1x16xf32> to vector<8x16xf32>
    %14 = arith.addf %12, %13 : vector<8x16xf32>
    %cst_11 = arith.constant 0.000000e+00 : f32
    %15 = vector.broadcast %cst_11 : f32 to vector<8x16xf32>
    %16 = arith.maximumf %14, %15 : vector<8x16xf32>
    %cst_12 = arith.constant dense<0.000000e+00> : vector<8x16xf32>
    %17 = tpu.matmul %16, %3, %cst_12 {dimension_numbers = #tpu.dot_dimension_numbers<[1], [0], [0], [1], [0, 0, 1, 1], [], []>} : vector<8x16xf32>, vector<16x16xf32>, vector<8x16xf32> -> vector<8x16xf32>
    %18 = vector.broadcast %6 : vector<1x16xf32> to vector<8x16xf32>
    %19 = arith.addf %17, %18 : vector<8x16xf32>
    %20 = tpu.iota {dimensions = array<i32: 1>} : vector<8x16xi32>
    %c2_i32 = arith.constant 2 : i32
    %21 = vector.broadcast %c2_i32 : i32 to vector<8x16xi32>
    %22 = arith.cmpi slt, %20, %21 : vector<8x16xi32>
    %cst_13 = arith.constant -1.000000e+30 : f32
    %23 = vector.broadcast %cst_13 : f32 to vector<8x16xf32>
    %24 = arith.select %22, %19, %23 : vector<8x16xi1>, vector<8x16xf32>
    %cst_14 = arith.constant dense<0xFF800000> : vector<8xf32>
    %25 = vector.multi_reduction <maximumf>, %24, %cst_14 [1] : vector<8x16xf32> to vector<8xf32>
    %26 = vector.shape_cast %25 : vector<8xf32> to vector<8x1xf32>
    %27 = vector.broadcast %26 : vector<8x1xf32> to vector<8x16xf32>
    %28 = arith.subf %19, %27 : vector<8x16xf32>
    %29 = math.exp %28 : vector<8x16xf32>
    %cst_15 = arith.constant 0.000000e+00 : f32
    %30 = vector.broadcast %cst_15 : f32 to vector<8x16xf32>
    %31 = arith.select %22, %29, %30 : vector<8x16xi1>, vector<8x16xf32>
    %cst_16 = arith.constant dense<0.000000e+00> : vector<8xf32>
    %32 = vector.multi_reduction <add>, %31, %cst_16 [1] : vector<8x16xf32> to vector<8xf32>
    %33 = vector.shape_cast %32 : vector<8xf32> to vector<8x1xf32>
    %cst_17 = arith.constant 1.000000e+00 : f32
    %34 = vector.broadcast %cst_17 : f32 to vector<8x1xf32>
    %35 = arith.divf %34, %33 : vector<8x1xf32>
    %36 = vector.broadcast %26 : vector<8x1xf32> to vector<8x16xf32>
    %37 = arith.subf %19, %36 : vector<8x16xf32>
    %38 = math.log %33 : vector<8x1xf32>
    %39 = vector.broadcast %38 : vector<8x1xf32> to vector<8x16xf32>
    %40 = arith.subf %37, %39 : vector<8x16xf32>
    %41 = arith.mulf %31, %40 : vector<8x16xf32>
    %cst_18 = arith.constant 0.000000e+00 : f32
    %42 = vector.broadcast %cst_18 : f32 to vector<8x16xf32>
    %43 = arith.select %22, %41, %42 : vector<8x16xi1>, vector<8x16xf32>
    %cst_19 = arith.constant dense<0.000000e+00> : vector<8xf32>
    %44 = vector.multi_reduction <add>, %43, %cst_19 [1] : vector<8x16xf32> to vector<8xf32>
    %45 = vector.shape_cast %44 : vector<8xf32> to vector<8x1xf32>
    %cst_20 = arith.constant 0.000000e+00 : f32
    %46 = vector.broadcast %cst_20 : f32 to vector<8x1xf32>
    %47 = arith.subf %46, %45 : vector<8x1xf32>
    %48 = arith.mulf %47, %35 : vector<8x1xf32>
    %c0_21 = arith.constant 0 : index
    %c0_22 = arith.constant 0 : index
    %49 = vector.load %arg0[%c0_21, %c0_22] : memref<8x1xf32, #tpu.memory_space<vmem>>, vector<8x1xf32>
    %c0_i32 = arith.constant 0 : i32
    %50 = vector.broadcast %c0_i32 : i32 to vector<8x16xi32>
    %51 = arith.cmpi eq, %20, %50 : vector<8x16xi32>
    %cst_23 = arith.constant 0.000000e+00 : f32
    %52 = vector.broadcast %cst_23 : f32 to vector<8x16xf32>
    %53 = arith.select %51, %31, %52 : vector<8x16xi1>, vector<8x16xf32>
    %cst_24 = arith.constant dense<0.000000e+00> : vector<8xf32>
    %54 = vector.multi_reduction <add>, %53, %cst_24 [1] : vector<8x16xf32> to vector<8xf32>
    %55 = vector.shape_cast %54 : vector<8xf32> to vector<8x1xf32>
    %56 = arith.mulf %55, %35 : vector<8x1xf32>
    %57 = arith.cmpf oge, %49, %56 : vector<8x1xf32>
    %58 = arith.extui %57 : vector<8x1xi1> to vector<8x1xi32>
    %59 = vector.broadcast %58 : vector<8x1xi32> to vector<8x16xi32>
    %60 = arith.cmpi eq, %20, %59 : vector<8x16xi32>
    %cst_25 = arith.constant 0.000000e+00 : f32
    %61 = vector.broadcast %cst_25 : f32 to vector<8x16xf32>
    %62 = arith.select %60, %40, %61 : vector<8x16xi1>, vector<8x16xf32>
    %cst_26 = arith.constant dense<0.000000e+00> : vector<8xf32>
    %63 = vector.multi_reduction <add>, %62, %cst_26 [1] : vector<8x16xf32> to vector<8xf32>
    %64 = vector.shape_cast %63 : vector<8xf32> to vector<8x1xf32>
    %65 = tpu.iota {dimensions = array<i32: 1>} : vector<8x128xi32>
    %c0_i32_27 = arith.constant 0 : i32
    %66 = vector.broadcast %c0_i32_27 : i32 to vector<8x128xi32>
    %67 = arith.cmpi eq, %65, %66 : vector<8x128xi32>
    %68 = arith.sitofp %58 : vector<8x1xi32> to vector<8x1xf32>
    %c1_i32 = arith.constant 1 : i32
    %69 = vector.broadcast %c1_i32 : i32 to vector<8x128xi32>
    %70 = arith.cmpi eq, %65, %69 : vector<8x128xi32>
    %71 = vector.shape_cast %64 : vector<8x1xf32> to vector<8x1xf32>
    %72 = vector.broadcast %71 : vector<8x1xf32> to vector<8x128xf32>
    %73 = vector.shape_cast %48 : vector<8x1xf32> to vector<8x1xf32>
    %74 = vector.broadcast %73 : vector<8x1xf32> to vector<8x128xf32>
    %75 = arith.select %70, %72, %74 : vector<8x128xi1>, vector<8x128xf32>
    %76 = vector.shape_cast %68 : vector<8x1xf32> to vector<8x1xf32>
    %77 = vector.broadcast %76 : vector<8x1xf32> to vector<8x128xf32>
    %78 = arith.select %67, %77, %75 : vector<8x128xi1>, vector<8x128xf32>
    %c0_28 = arith.constant 0 : index
    %c0_29 = arith.constant 0 : index
    %79 = vector.load %arg4[%c0_28, %c0_29] : memref<8x128xf32, #tpu.memory_space<vmem>>, vector<8x128xf32>
    tpu.vector_store %arg4[%c0_28, %c0_29], %78 {strides = array<i32>} : memref<8x128xf32, #tpu.memory_space<vmem>>, vector<8x128xf32>,
    return
  }
}

</mosaic_0001>

<bundles_post_ra>
// kernel: tpu_custom_call.1
= control target key start
LH: loop header
LB: loop body
LE: loop exit
PB: predicated region body
PF: predicated region fallthrough
CT: control target
= control target key end

     0   :  { %vm31_vm0 = vcmask 64512   ;;  %v406_v2 = vmov 0.0   ;;  %vm407_vm1 = vmmov 0   ;;  %s495_s0 = inlined_call_operand.vmem [shape: f32[8,1], index: 0, kind: input, shape index: {}]   ;;  %s496_s1 = inlined_call_operand.vmem [shape: f32[8,8], index: 1, kind: input, shape index: {}]   ;;  %s497_s2 = inlined_call_operand.vmem [shape: f32[40,16], index: 2, kind: input, shape index: {}]   ;;  %s498_s3 = inlined_call_operand.vmem [shape: f32[3,16], index: 3, kind: input, shape index: {}]   ;;  %s499_s4 = inlined_call_operand.hbm [shape: f32[8,128], index: 4, kind: output, shape index: {}]  }
   0x1   :  { %v19_v0 = vld [vmem:[%s497_s2] sm:$0xff]  ;;  %344 = vmatprep.subr.mxu0 %v406_v2  ;;  %346 = vmatprep.mubr.msk.f32.mxu0 %vm407_vm1, %v406_v2 }
   0x2   :  { %v18_v1 = vld [vmem:[%s496_s1] sm:$0xff] }
   0x3   :  { %9 = vsyncpa [#allocation3], 0  ;;  %345 = vmatpush3.msra.mxu0 %v19_v0  ;;  %353 = vmatprep.mubr.msk.f32.mxu1 %vm407_vm1, %v406_v2  ;;  %v20_v3 = vld [vmem:[%s497_s2 + $0x8] sm:$0xff]  ;;  %v21_v4 = vld [vmem:[%s497_s2 + $0x10] sm:$0xff]  ;;  %v408_v6 = vmov 0.0|0.0   ;;  %vm110_vm2 = vcmask 130048   ;;  %v262_v20 = vlaneseq }
   0x4   :  { %347 = vmatmul.mubr.msk.f32.vlgmr.msra.gmra.mrb[0].mxu0 %vm31_vm0, %v18_v1  ;;  %v364_v5 = vpack.c.bf16 %v21_v4, %v20_v3  ;;  %363 = vmatprep.subr.bf16.mxu1 %v408_v6  ;;  %v329_v7 = vld [vmem:[%s498_s3] ss:$0 sm:$0xff]  ;;  %v22_v12 = vld [vmem:[%s497_s2 + $0x18] sm:$0xff]  ;;  %v331_v15 = vld [vmem:[%s498_s3 + $0x1] ss:$0 sm:$0xff]  ;;  %v409_v36 = vmov 0  }
   0x5   :  { %360 = vmatprep.mubr.msk.f32.mxu0 %vm407_vm1, %v406_v2  ;;  %366 = vmatprep.subr.bf16.mxu0 %v408_v6  ;;  %v23_v13 = vld [vmem:[%s497_s2 + $0x20] sm:$0xff]  ;;  %v263_v21 = vand.u32 127, %v262_v20 }
   0x6   :  { %365 = vmatpush3.bf16.msra.mxu1 %v364_v5  ;;  %v367_v14 = vpack.c.bf16 %v23_v13, %v22_v12  ;;  %v333_v22 = vld [vmem:[%s498_s3 + $0x2] ss:$0 sm:$0xff]  ;;  %374 = vset.pattern.permute.xlu1 %v409_v36 }
   0x7   :  { %vm264_vm3 = vcmp.lt.s32.totalorder %v263_v21, 2  ;;  %vm289_vm4 = vcmp.eq.s32.totalorder %v263_v21, 0  ;;  %375 = vset.pattern.permute.xlu0 %v409_v36  ;;  %v288_v39 = vld [vmem:[%s495_s0] sm:$0xff]  ;;  %vm306_vm7 = vcmp.eq.s32.totalorder %v263_v21, 1  ;;  %s410_s0 = smov [#allocation2]  }
   0x8   :  { %368 = vmatpush3.bf16.msra.mxu0 %v367_v14  ;;  %s321_s6 = sshll.u32 %s410_s0, 4  ;;  %s322_s6 = int_to_ptr.vmem [resolvable:$true] %s321_s6 }
   0x9   :  { %s382_s7 = scalar_lea.vmem %s322_s6, 128  ;;  %p387_p1 = scmp.lt.s32.totalorder %s322_s6, %s322_s6 }
   0xa   :  { %p383_p0 = scmp.ne.s32.totalorder %s322_s6, %s382_s7  ;;  %p388_p2 = scmp.lt.s32.totalorder %s382_s7, %s382_s7 }
   0xc   :  { %p389_p3 = por %p388_p2, %p387_p1 }
   0xe   :  { %p390_p4 = pnand %p389_p3, %p383_p0 }
  0xd7   :  { %v101_v8 = vpop.f32.mrb[0].mxu0 }
  0xd8   :  { %v102_v9 = vadd.f32 %v329_v7, %v101_v8  ;;  %v348_v10 = vpop.f32.mrb[1].mxu0 }
  0xda   :  { %v105_v11 = vmax.f32 %v102_v9, 0.0 }
  0xdc   :  { %354 = vmatmul.mubr.msk.f32.vlgmr.msra.gmra.mrb[0].mxu1 %vm110_vm2, %v105_v11 }
 0x1af   :  { %v180_v16 = vpop.f32.mrb[0].mxu1 }
 0x1b0   :  { %v181_v17 = vadd.f32 %v331_v15, %v180_v16  ;;  %v355_v18 = vpop.f32.mrb[1].mxu1 }
 0x1b2   :  { %v184_v19 = vmax.f32 %v181_v17, 0.0 }
 0x1b4   :  { %361 = vmatmul.mubr.msk.f32.vlgmr.msra.gmra.mrb[2].mxu0 %vm110_vm2, %v184_v19 }
 0x287   :  { %v258_v23 = vpop.f32.mrb[2].mxu0 }
 0x288   :  { %v259_v24 = vadd.f32 %v333_v22, %v258_v23  ;;  %v362_v25 = vpop.f32.mrb[3].mxu0 }
 0x28a   :  { %v265_v26 = vsel %vm264_vm3, %v259_v24, -1e+30 }
 0x28b   :  { %v266_v27 = vsel %vm110_vm2, %v265_v26, -inf }
 0x28c   :  { %267 = vmax.xlane.f32.xlu0 %v266_v27 }
 0x319   :  { %v268_v28 = vpop.xlane.xlu0 %267 }
 0x31a   :  { %v269_v29 = vsub.f32 %v259_v24, %v268_v28 }
 0x31c   :  { %v270_v30 = vmul.f32 1.442695, %v269_v29 }
 0x31e   :  { %376 = vpow2.f32 %v270_v30 }
 0x328   :  { %v377_v31 = vpop.eup %376 }
 0x329   :  { %v272_v32 = vsel %vm264_vm3, %v377_v31, 0.0 }
 0x32a   :  { %v273_v33 = vsel %vm110_vm2, %v272_v32, 0.0  ;;  %v290_v34 = vsel %vm289_vm4, %v272_v32, 0.0 }
 0x32b   :  { %274 = vadd.xlane.f32.xlu0 %v273_v33  ;;  %v291_v35 = vsel %vm110_vm2, %v290_v34, 0.0 }
 0x32c   :  { %292 = vadd.xlane.f32.xlu1 %v291_v35 }
 0x3b8   :  { %v275_v37 = vpop.xlane.xlu0 %274 }
 0x3b9   :  { %378 = vrcp.f32 %v275_v37  ;;  %v293_v40 = vpop.xlane.xlu1 %292 }
 0x3ba   :  { %380 = vlog2.f32 %v275_v37 }
 0x3c3   :  { %v379_v38 = vpop.eup %378 }
 0x3c4   :  { %v381_v41 = vpop.eup %380  ;;  %v294_v42 = vmul.f32 %v379_v38, %v293_v40 }
 0x3c5   :  { %v279_v43 = vmul.f32 0.6931472, %v381_v41 }
 0x3c6   :  { %vm295_vm5 = vcmp.ge.f32.partialorder %v288_v39, %v294_v42 }
 0x3c7   :  { %v296_v44 = vsel %vm295_vm5, 1, %v409_v36  ;;  %v280_v45 = vsub.f32 %v269_v29, %v279_v43  ;;  %v335_v52 = vsel %vm295_vm5, 1.0, %v406_v2 }
 0x3c8   :  { %298 = vperm.xlu1 %374, %v296_v44  }
 0x3c9   :  { %v281_v46 = vmul.f32 %v280_v45, %v272_v32 }
 0x3cb   :  { %v282_v47 = vsel %vm264_vm3, %v281_v46, 0.0 }
 0x3cc   :  { %v283_v48 = vsel %vm110_vm2, %v282_v47, 0.0 }
 0x3cd   :  { %284 = vadd.xlane.f32.xlu0 %v283_v48 }
 0x447   :  { %v299_v49 = vpop.permute.xlu1 %298 }
 0x448   :  { %vm300_vm6 = vcmp.eq.s32.totalorder %v263_v21, %v299_v49 }
 0x449   :  { %v301_v50 = vsel %vm300_vm6, %v280_v45, 0.0 }
 0x44a   :  { %v302_v51 = vsel %vm110_vm2, %v301_v50, 0.0 }
 0x44b   :  { %303 = vadd.xlane.f32.xlu0 %v302_v51 }
 0x45a   :  { %v285_v53 = vpop.xlane.xlu0 %284 }
 0x45b   :  { %v286_v54 = vsub.f32 0.0, %v285_v53 }
 0x45d   :  { %v287_v56 = vmul.f32 %v379_v38, %v286_v54 }
 0x461   :  { %310 = vperm.xlu0 %375, %v335_v52  }
 0x4d8   :  { %v304_v55 = vpop.xlane.xlu0 %303 }
 0x4d9   :  { %v307_v57 = vsel %vm306_vm7, %v304_v55, %v287_v56 }
 0x4e0   :  { %v311_v58 = vpop.permute.xlu0 %310 }
 0x4e1   :  { %v313_v59 = vsel %vm289_vm4, %v311_v58, %v307_v57 }
 0x4e2   :  { %314 = vst [vmem:[#allocation2] sm:$0xff] %v313_v59 }
 0x4e3   :  { %393 = shalt.err (!%p390_p4)
}
 0x4e4   :  { %s394_s10 = scalar_lea.hbm %s499_s4, 128 }
 0x4e5   :  { %p395_p5 = scmp.ne.s32.totalorder %s499_s4, %s394_s10  ;;  %p398_p6 = scmp.lt.u32.totalorder %s394_s10, %s499_s4 }
 0x4e7   :  { %p400_p7 = pnand %p398_p6, %p395_p5 }
 0x4e9   :  { %403 = shalt.err (!%p400_p7)
}
 0x4ea   :  { %324 = dma.vmem_to_hbm [thread:$0]  %s322_s6, 128, %s499_s4, [#allocation3]  }
 0x4eb   :  { %404 = dma.done.wait [#allocation3], 128  }
 0x4ec   :  { %405 = vsyncadd [#allocation3], 4294967168 }
 0x4ed   :  { %328 = vsyncpa [#allocation3], 1 }

</bundles_post_ra>
